<compile_context>
chip_gen: v7x
topology: tpu7x:2x2x1
jax: 0.10.0
libtpu: 0.0.40
codegen_flags: <defaults>
</compile_context>

<pallas_src>
import jax
import jax.numpy as jnp
from jax.experimental import pallas as pl
from jax.experimental.pallas import tpu as pltpu


def _self_attn_pool_kernel(x_ref, w_ref, o_ref):
    # x_ref: (BN, T, H)  VMEM   input block
    # w_ref: (1, 1, H)   VMEM   linear weight (scoring vector)
    # o_ref: (BN, H)     VMEM   pooled output block (dense sublane/lane store)
    x = x_ref[...].astype(jnp.float32)            # no-op copy for f32 inputs
    w = w_ref[0, 0, :].astype(jnp.float32)        # (H,)

    # scores[b, t] = sum_h x[b, t, h] * w[h]   (VPU mul + XLU lane-reduce)
    s = jnp.sum(x * w, axis=-1)                   # (BN, T) f32

    # numerically stable softmax over T (exact division)
    m = jnp.max(s, axis=-1, keepdims=True)        # (BN, 1)
    e = jnp.exp(s - m)                            # (BN, T)
    p = e / jnp.sum(e, axis=-1, keepdims=True)    # (BN, T) f32

    # pooled[b, h] = sum_t p[b, t] * x[b, t, h]  (VPU mul + sublane reduce)
    pooled = jnp.sum(x * p[..., None], axis=1)    # (BN, H) f32
    o_ref[...] = pooled.astype(o_ref.dtype)


def _padded_row_bytes(T, H, itemsize):
    """Bytes per batch row as laid out in VMEM (lane dim padded to 128,
    sublane dim padded to the dtype's sublane tile)."""
    sub = 8 * max(1, 4 // itemsize)               # 8 for f32, 16 for bf16
    t_pad = pl.cdiv(T, sub) * sub
    h_pad = pl.cdiv(H, 128) * 128
    return t_pad * h_pad * itemsize


def _choose_block_n(N, T, H, itemsize):
    """Batch block size: multiple of 8, padded block ~<=12 MiB (so 2 pipeline
    buffers + f32 temps fit v7x's 64 MiB VMEM; also fine on v5e/v6e), and
    >=4 grid steps when the batch allows (>=2 per TensorCore on v7x)."""
    per_row = _padded_row_bytes(T, H, itemsize)
    target = 12 * 2**20
    bn = max(8, target // max(1, per_row))
    bn -= bn % 8
    n_ceil8 = pl.cdiv(N, 8) * 8
    bn = min(bn, n_ceil8)
    if n_ceil8 >= 32 and pl.cdiv(n_ceil8, bn) < 4:
        bn = max(8, ((n_ceil8 // 4) // 8) * 8)
    return max(8, bn)


def self_attention_pooling(batch_rep, weight, bias, *, block_n=None):
    """batch_rep: (N, T, H); weight: (1, H); bias: (1,) -> (N, H).

    Note: `bias` is accepted for API parity with nn.Linear(H, 1) but is not
    used inside the kernel — softmax is invariant to a scalar shift, so the
    bias add is a mathematical no-op.
    """
    del bias  # shift-invariant under softmax
    N, T, H = batch_rep.shape
    dtype = batch_rep.dtype
    itemsize = jnp.dtype(dtype).itemsize
    if block_n is None:
        block_n = _choose_block_n(N, T, H, itemsize)

    n_pad = pl.cdiv(N, block_n) * block_n
    x = batch_rep
    if n_pad != N:
        x = jnp.pad(x, ((0, n_pad - N), (0, 0), (0, 0)))
    w3 = weight.reshape(1, 1, H).astype(dtype)

    # VMEM budget from padded shapes: 2x input block (double buffer) +
    # ~1x block of f32 temps + small outputs / headroom; clamp to stay safe
    # on v7x (64 MiB physical) while still generous on v5e/v6e (128 MiB).
    padded_block = block_n * _padded_row_bytes(T, H, itemsize)
    vmem_limit = int(min(48 * 2**20,
                         max(32 * 2**20, 3 * padded_block + 4 * 2**20)))

    cost = pl.CostEstimate(
        flops=4 * N * T * H,                 # two mul-add passes over the block
        transcendentals=N * T,               # exp in the softmax
        bytes_accessed=(N * T * H + N * H + H) * itemsize,
    )

    out = pl.pallas_call(
        _self_attn_pool_kernel,
        out_shape=jax.ShapeDtypeStruct((n_pad, H), dtype),
        grid_spec=pltpu.PrefetchScalarGridSpec(
            num_scalar_prefetch=0,
            grid=(n_pad // block_n,),
            in_specs=[
                pl.BlockSpec((block_n, T, H), lambda n: (n, 0, 0)),  # batch_rep
                pl.BlockSpec((1, 1, H), lambda n: (0, 0, 0)),        # weight
            ],
            out_specs=pl.BlockSpec((block_n, H), lambda n: (n, 0)),
        ),
        compiler_params=pltpu.CompilerParams(
            dimension_semantics=("parallel",),
            vmem_limit_bytes=vmem_limit,
        ),
        cost_estimate=cost,
    )(x, w3)
    return out[:N]
    # TODO(synk): if production T*H is large enough that even BN=8 exceeds the
    # ~12 MiB v7x block budget, add a trailing "arbitrary" T grid axis with
    # online-softmax (m, l, acc) VMEM scratch to bound the per-step block.


def _reference(batch_rep, weight, bias):
    scores = jnp.einsum("nth,oh->nto", batch_rep, weight)[..., 0] + bias[0]  # (N, T)
    att_w = jax.nn.softmax(scores, axis=-1)[..., None]                       # (N, T, 1)
    return jnp.sum(batch_rep * att_w, axis=1)                                # (N, H)


if __name__ == "__main__":
    key = jax.random.PRNGKey(0)
    kx, kw, kb, kx2 = jax.random.split(key, 4)

    N, T, H = 16, 8, 32
    batch_rep = jax.random.normal(kx, (N, T, H), dtype=jnp.float32)
    # nn.Linear(H, 1) default init: U(-1/sqrt(H), 1/sqrt(H)), deterministic here.
    bound = 1.0 / (H ** 0.5)
    weight = jax.random.uniform(kw, (1, H), minval=-bound, maxval=bound,
                                dtype=jnp.float32)
    bias = jax.random.uniform(kb, (1,), minval=-bound, maxval=bound,
                              dtype=jnp.float32)

    out = jax.block_until_ready(self_attention_pooling(batch_rep, weight, bias))
    ref = _reference(batch_rep, weight, bias)
    assert out.shape == (N, H)
    assert jnp.allclose(out, ref, atol=1e-5, rtol=1e-5)

    # Also exercise the padded-tail path (N not a multiple of the batch block).
    N2 = 5
    batch_rep2 = jax.random.normal(kx2, (N2, T, H), dtype=jnp.float32)
    out2 = jax.block_until_ready(self_attention_pooling(batch_rep2, weight, bias))
    ref2 = _reference(batch_rep2, weight, bias)
    assert out2.shape == (N2, H)
    assert jnp.allclose(out2, ref2, atol=1e-5, rtol=1e-5)

    print("KERNEL_OK")
</pallas_src>

<mosaic_0001>
module attributes {stable_mosaic.version = 11 : i64} {
  func.func @_self_attn_pool_kernel(%arg0: i32, %arg1: memref<16x8x32xf32, #tpu.memory_space<vmem>>, %arg2: memref<1x1x32xf32, #tpu.memory_space<vmem>>, %arg3: memref<16x32xf32, #tpu.memory_space<vmem>>) attributes {dimension_semantics = [#tpu.dimension_semantics<parallel>], iteration_bounds = array<i64: 1>, scalar_prefetch = 0 : i64, scratch_operands = 0 : i64, tpu.core_type = #tpu.core_type<tc>, window_params = [{transform_indices = @transform_0, window_bounds = array<i64: 16, 8, 32>}, {pipeline_mode = #tpu.pipeline_mode<synchronous>, transform_indices = @transform_1, window_bounds = array<i64: 1, 1, 32>}, {transform_indices = @transform_2, window_bounds = array<i64: 16, 32>}]} {
    %c0 = arith.constant 0 : index
    %c0_0 = arith.constant 0 : index
    %c0_1 = arith.constant 0 : index
    %0 = vector.load %arg1[%c0, %c0_0, %c0_1] : memref<16x8x32xf32, #tpu.memory_space<vmem>>, vector<16x8x32xf32>
    %c0_2 = arith.constant 0 : index
    %c0_3 = arith.constant 0 : index
    %c0_4 = arith.constant 0 : index
    %1 = vector.load %arg2[%c0_2, %c0_3, %c0_4] : memref<1x1x32xf32, #tpu.memory_space<vmem>>, vector<1x1x32xf32>
    %2 = vector.shape_cast %1 : vector<1x1x32xf32> to vector<32xf32>
    %3 = vector.shape_cast %2 : vector<32xf32> to vector<1x1x32xf32>
    %4 = vector.broadcast %3 : vector<1x1x32xf32> to vector<16x8x32xf32>
    %5 = arith.mulf %0, %4 : vector<16x8x32xf32>
    %cst = arith.constant dense<0.000000e+00> : vector<16x8xf32>
    %6 = vector.multi_reduction <add>, %5, %cst [2] : vector<16x8x32xf32> to vector<16x8xf32>
    %cst_5 = arith.constant dense<0xFF800000> : vector<16xf32>
    %7 = vector.multi_reduction <maximumf>, %6, %cst_5 [1] : vector<16x8xf32> to vector<16xf32>
    %8 = vector.shape_cast %7 : vector<16xf32> to vector<16x1xf32>
    %9 = vector.broadcast %8 : vector<16x1xf32> to vector<16x8xf32>
    %10 = arith.subf %6, %9 : vector<16x8xf32>
    %11 = math.exp %10 : vector<16x8xf32>
    %cst_6 = arith.constant dense<0.000000e+00> : vector<16xf32>
    %12 = vector.multi_reduction <add>, %11, %cst_6 [1] : vector<16x8xf32> to vector<16xf32>
    %13 = vector.shape_cast %12 : vector<16xf32> to vector<16x1xf32>
    %14 = vector.broadcast %13 : vector<16x1xf32> to vector<16x8xf32>
    %15 = arith.divf %11, %14 : vector<16x8xf32>
    %16 = vector.shape_cast %15 : vector<16x8xf32> to vector<16x8x1xf32>
    %17 = vector.broadcast %16 : vector<16x8x1xf32> to vector<16x8x32xf32>
    %18 = arith.mulf %0, %17 : vector<16x8x32xf32>
    %cst_7 = arith.constant dense<0.000000e+00> : vector<16x32xf32>
    %19 = vector.multi_reduction <add>, %18, %cst_7 [1] : vector<16x8x32xf32> to vector<16x32xf32>
    %c0_8 = arith.constant 0 : index
    %c0_9 = arith.constant 0 : index
    %20 = vector.load %arg3[%c0_8, %c0_9] : memref<16x32xf32, #tpu.memory_space<vmem>>, vector<16x32xf32>
    tpu.vector_store %arg3[%c0_8, %c0_9], %19 {strides = array<i32>} : memref<16x32xf32, #tpu.memory_space<vmem>>, vector<16x32xf32>,
    return
  }
  func.func @transform_0(%arg0: i32) -> (i32, i32, i32) {
    %c0_i32 = arith.constant 0 : i32
    %c0_i32_0 = arith.constant 0 : i32
    %c0_i32_1 = arith.constant 0 : i32
    return %arg0, %c0_i32, %c0_i32_0 : i32, i32, i32
  }
  func.func @transform_1(%arg0: i32) -> (i32, i32, i32) {
    %c0_i32 = arith.constant 0 : i32
    %c0_i32_0 = arith.constant 0 : i32
    %c0_i32_1 = arith.constant 0 : i32
    %c0_i32_2 = arith.constant 0 : i32
    return %c0_i32, %c0_i32_0, %c0_i32_1 : i32, i32, i32
  }
  func.func @transform_2(%arg0: i32) -> (i32, i32) {
    %c0_i32 = arith.constant 0 : i32
    %c0_i32_0 = arith.constant 0 : i32
    return %arg0, %c0_i32 : i32, i32
  }
}

</mosaic_0001>

<bundles_post_ra>
// kernel: tpu_custom_call.1
= control target key start
LH: loop header
LB: loop body
LE: loop exit
PB: predicated region body
PF: predicated region fallthrough
CT: control target
= control target key end

     0   :  { %7 = vsyncpa [#allocation3], 0  ;;  %s1426_s0 = inlined_call_operand.hbm [shape: f32[16,8,32], index: 0, kind: input, shape index: {}]   ;;  %s1427_s1 = inlined_call_operand.vmem [shape: f32[1,1,32], index: 1, kind: input, shape index: {}]   ;;  %s1428_s2 = inlined_call_operand.hbm [shape: f32[16,32], index: 2, kind: output, shape index: {}]  }
   0x1   :  { %8 = vsyncpa [#allocation4], 0  ;;  %s999_s9 = smov [#allocation2]   ;;  %s951_s13 = scalar_lea.hbm %s1426_s0, 2048 }
   0x2   :  { %s14_s10 = sshll.u32 %s999_s9, 4  ;;  %p952_p0 = scmp.ne.s32.totalorder %s1426_s0, %s951_s13  ;;  %s15_s10 = int_to_ptr.vmem [resolvable:$true] %s14_s10 }
   0x3   :  { %p955_p1 = scmp.lt.u32.totalorder %s951_s13, %s1426_s0 }
   0x5   :  { %p957_p2 = pnand %p955_p1, %p952_p0 }
   0x7   :  { %960 = shalt.err (!%p957_p2)
}
   0x8   :  { %s961_s18 = scalar_lea.vmem %s15_s10, 2048  ;;  %p966_p4 = scmp.lt.s32.totalorder %s15_s10, %s15_s10 }
   0x9   :  { %p962_p3 = scmp.ne.s32.totalorder %s15_s10, %s961_s18  ;;  %p967_p5 = scmp.lt.s32.totalorder %s961_s18, %s961_s18 }
   0xb   :  { %p968_p6 = por %p967_p5, %p966_p4 }
   0xd   :  { %p969_p7 = pnand %p968_p6, %p962_p3 }
   0xf   :  { %972 = shalt.err (!%p969_p7)
}
  0x10   :  { %s1000_s19 = smov 128   ;;  %s1001_s20 = smov 8  }
  0x11   :  { %20 = dma.hbm_to_vmem [thread:$0]  %s1426_s0, 2048, %s15_s10, [#allocation3], %s1000_s19, %s1000_s19, %s1001_s20  }
  0x12   :  { %995 = dma.done.wait [#allocation3], 2048  }
  0x13   :  { %996 = vsyncadd [#allocation3], 4294965248  ;;  %v1034_v0 = vld [vmem:[#allocation2 + $0x40] sm:$0xff]  ;;  %vm65_vm0 = vcmask 261120   ;;  %v1043_v5 = vld [vmem:[#allocation2 + $0x48] sm:$0xff]  ;;  %v130_v55 = vlaneseq  ;;  %vm196_vm1 = vcmask 1041409  }
  0x14   :  { %v879_v1 = vld [vmem:[%s1427_s1] ss:$0 sm:$0xff]  ;;  %v1045_v6 = vld [vmem:[#allocation2 + $0x8] sm:$0xff]  ;;  %v1049_v9 = vld [vmem:[#allocation2 + $0x50] sm:$0xff]  ;;  %vm198_vm2 = vcmask 1042434   ;;  %vm200_vm3 = vcmask 1043459  }
  0x15   :  { %v1039_v2 = vld [vmem:[#allocation2] sm:$0xff]  ;;  %v57_v3 = vmul.f32 %v879_v1, %v1034_v0  ;;  %v58_v7 = vmul.f32 %v879_v1, %v1043_v5  ;;  %v50_v8 = vmul.f32 %v879_v1, %v1045_v6  ;;  %v1051_v10 = vld [vmem:[#allocation2 + $0x10] sm:$0xff]  ;;  %v59_v15 = vmul.f32 %v879_v1, %v1049_v9  ;;  %v1059_v17 = vld [vmem:[#allocation2 + $0x58] sm:$0xff]  ;;  %s1003_s0 = smov [#allocation5]  }
  0x16   :  { %v49_v4 = vmul.f32 %v879_v1, %v1039_v2  ;;  %v51_v16 = vmul.f32 %v879_v1, %v1051_v10  ;;  %v1061_v18 = vld [vmem:[#allocation2 + $0x18] sm:$0xff]  ;;  %v60_v21 = vmul.f32 %v879_v1, %v1059_v17  ;;  %v1067_v23 = vld [vmem:[#allocation2 + $0x60] sm:$0xff]  ;;  %v1075_v29 = vld [vmem:[#allocation2 + $0x68] sm:$0xff]  ;;  %v131_v58 = vand.u32 127, %v130_v55  ;;  %s867_s1 = sshll.u32 %s1003_s0, 4  ;;  %s868_s1 = int_to_ptr.vmem [resolvable:$true] %s867_s1 }
  0x17   :  { %v90_v11 = vsel %vm65_vm0, %v57_v3, 0.0  ;;  %v93_v13 = vsel %vm65_vm0, %v58_v7, 0.0  ;;  %v69_v14 = vsel %vm65_vm0, %v50_v8, 0.0  ;;  %v96_v19 = vsel %vm65_vm0, %v59_v15, 0.0  ;;  %v1069_v24 = vld [vmem:[#allocation2 + $0x20] sm:$0xff]  ;;  %v1077_v30 = vld [vmem:[#allocation2 + $0x28] sm:$0xff]  ;;  %p978_p9 = scmp.lt.s32.totalorder %s868_s1, %s868_s1 }
  0x18   :  { %v66_v12 = vsel %vm65_vm0, %v49_v4, 0.0  ;;  %91 = vadd.xlane.f32.xlu1 %v90_v11  ;;  %v72_v20 = vsel %vm65_vm0, %v51_v16, 0.0  ;;  %v52_v22 = vmul.f32 %v879_v1, %v1061_v18  ;;  %v99_v25 = vsel %vm65_vm0, %v60_v21, 0.0  ;;  %v1083_v35 = vld [vmem:[#allocation2 + $0x70] sm:$0xff]  ;;  %v1091_v41 = vld [vmem:[#allocation2 + $0x78] sm:$0xff]  ;;  %s973_s25 = scalar_lea.vmem %s868_s1, 256 }
  0x19   :  { %67 = vadd.xlane.f32.xlu0 %v66_v12  ;;  %v61_v27 = vmul.f32 %v879_v1, %v1067_v23  ;;  %v53_v28 = vmul.f32 %v879_v1, %v1069_v24  ;;  %v62_v33 = vmul.f32 %v879_v1, %v1075_v29  ;;  %v54_v34 = vmul.f32 %v879_v1, %v1077_v30  ;;  %v1085_v36 = vld [vmem:[#allocation2 + $0x30] sm:$0xff]  ;;  %v1093_v42 = vld [vmem:[#allocation2 + $0x38] sm:$0xff]  ;;  %p974_p8 = scmp.ne.s32.totalorder %s868_s1, %s973_s25  ;;  %p979_p10 = scmp.lt.s32.totalorder %s973_s25, %s973_s25 }
  0x1a   :  { %v75_v26 = vsel %vm65_vm0, %v52_v22, 0.0  ;;  %v63_v39 = vmul.f32 %v879_v1, %v1083_v35  ;;  %v55_v40 = vmul.f32 %v879_v1, %v1085_v36  ;;  %v64_v45 = vmul.f32 %v879_v1, %v1091_v41 }
  0x1b   :  { %v102_v31 = vsel %vm65_vm0, %v61_v27, 0.0  ;;  %v78_v32 = vsel %vm65_vm0, %v53_v28, 0.0  ;;  %v105_v37 = vsel %vm65_vm0, %v62_v33, 0.0  ;;  %v81_v38 = vsel %vm65_vm0, %v54_v34, 0.0  ;;  %p980_p11 = por %p979_p10, %p978_p9 }
  0x1c   :  { %94 = vadd.xlane.f32.xlu1 %v93_v13  ;;  %v108_v43 = vsel %vm65_vm0, %v63_v39, 0.0  ;;  %v84_v44 = vsel %vm65_vm0, %v55_v40, 0.0  ;;  %v56_v46 = vmul.f32 %v879_v1, %v1093_v42  ;;  %v111_v47 = vsel %vm65_vm0, %v64_v45, 0.0 }
  0x1d   :  { %70 = vadd.xlane.f32.xlu0 %v69_v14  ;;  %v1117_v59 = vshrl.u32 %v130_v55, 7  ;;  %vm202_vm4 = vcmask 1044484   ;;  %vm204_vm5 = vcmask 1045509   ;;  %vm206_vm6 = vcmask 1046534   ;;  %p981_p12 = pnand %p980_p11, %p974_p8 }
  0x1e   :  { %v87_v48 = vsel %vm65_vm0, %v56_v46, 0.0  ;;  %vm208_vm7 = vcmask 1047559   ;;  %vm219_vm8 = vcmask 64512  }
  0x1f   :  { %v1124_v62 = vsub.s32 %v131_v58, %v1117_v59 }
  0x20   :  { %97 = vadd.xlane.f32.xlu1 %v96_v19 }
  0x21   :  { %73 = vadd.xlane.f32.xlu0 %v72_v20 }
  0x24   :  { %100 = vadd.xlane.f32.xlu1 %v99_v25 }
  0x25   :  { %76 = vadd.xlane.f32.xlu0 %v75_v26 }
  0x28   :  { %103 = vadd.xlane.f32.xlu1 %v102_v31 }
  0x29   :  { %79 = vadd.xlane.f32.xlu0 %v78_v32 }
  0x2c   :  { %106 = vadd.xlane.f32.xlu1 %v105_v37 }
  0x2d   :  { %82 = vadd.xlane.f32.xlu0 %v81_v38 }
  0x30   :  { %109 = vadd.xlane.f32.xlu1 %v108_v43 }
  0x31   :  { %85 = vadd.xlane.f32.xlu0 %v84_v44 }
  0x34   :  { %112 = vadd.xlane.f32.xlu1 %v111_v47 }
  0x35   :  { %88 = vadd.xlane.f32.xlu0 %v87_v48 }
  0xa5   :  { %v1101_v49 = vpop.xlane.xlu1 %91 }
  0xa6   :  { %v1103_v50 = vpop.xlane.xlu0 %67  ;;  %v167_v3 = vrot.slane %v1101_v49, %v1124_v62 }
  0xa7   :  { %v135_v12 = vrot.slane %v1103_v50, %v1124_v62 }
  0xa9   :  { %v1105_v51 = vpop.xlane.xlu1 %94 }
  0xaa   :  { %v1107_v52 = vpop.xlane.xlu0 %70  ;;  %v171_v4 = vrot.slane %v1105_v51, %v1124_v62 }
  0xab   :  { %v139_v7 = vrot.slane %v1107_v52, %v1124_v62 }
  0xac   :  { %v210_v21 = vsel %vm196_vm1, %v171_v4, %v167_v3 }
  0xad   :  { %v1109_v53 = vpop.xlane.xlu1 %97  ;;  %v197_v22 = vsel %vm196_vm1, %v139_v7, %v135_v12  ;;  %v1002_v7 = vmov 0  }
  0xae   :  { %v1111_v54 = vpop.xlane.xlu0 %73  ;;  %v175_v8 = vrot.slane %v1109_v53, %v1124_v62  ;;  %886 = vset.pattern.permute.xlu1 %v1002_v7  ;;  %885 = vset.pattern.permute.xlu0 %v1002_v7 }
  0xaf   :  { %v143_v11 = vrot.slane %v1111_v54, %v1124_v62 }
  0xb0   :  { %v211_v27 = vsel %vm198_vm2, %v175_v8, %v210_v21  ;;  %v1184_v8 = vsub.s32 0, %v1117_v59  ;;  %v1199_v21 = vsub.s32 5, %v1117_v59 }
  0xb1   :  { %v1113_v56 = vpop.xlane.xlu1 %100  ;;  %v199_v28 = vsel %vm198_vm2, %v143_v11, %v197_v22  ;;  %v1187_v11 = vsub.s32 1, %v1117_v59 }
  0xb2   :  { %v1115_v57 = vpop.xlane.xlu0 %76  ;;  %v179_v13 = vrot.slane %v1113_v56, %v1124_v62 }
  0xb3   :  { %v147_v14 = vrot.slane %v1115_v57, %v1124_v62 }
  0xb4   :  { %v212_v33 = vsel %vm200_vm3, %v179_v13, %v211_v27  ;;  %v1192_v13 = vsub.s32 4, %v1117_v59 }
  0xb5   :  { %v1119_v60 = vpop.xlane.xlu1 %103  ;;  %v201_v34 = vsel %vm200_vm3, %v147_v14, %v199_v28  ;;  %v1206_v28 = vsub.s32 2, %v1117_v59 }
  0xb6   :  { %v1121_v61 = vpop.xlane.xlu0 %79  ;;  %v183_v15 = vrot.slane %v1119_v60, %v1124_v62 }
  0xb7   :  { %v151_v16 = vrot.slane %v1121_v61, %v1124_v62 }
  0xb8   :  { %v213_v37 = vsel %vm202_vm4, %v183_v15, %v212_v33 }
  0xb9   :  { %v1126_v63 = vpop.xlane.xlu1 %106  ;;  %v203_v38 = vsel %vm202_vm4, %v151_v16, %v201_v34 }
  0xba   :  { %v1128_v1 = vpop.xlane.xlu0 %82  ;;  %v187_v25 = vrot.slane %v1126_v63, %v1124_v62 }
  0xbb   :  { %v155_v26 = vrot.slane %v1128_v1, %v1124_v62 }
  0xbc   :  { %v214_v45 = vsel %vm204_vm5, %v187_v25, %v213_v37 }
  0xbd   :  { %v1150_v19 = vpop.xlane.xlu1 %109  ;;  %v205_v46 = vsel %vm204_vm5, %v155_v26, %v203_v38 }
  0xbe   :  { %v1152_v20 = vpop.xlane.xlu0 %85  ;;  %v191_v31 = vrot.slane %v1150_v19, %v1124_v62 }
  0xbf   :  { %v159_v32 = vrot.slane %v1152_v20, %v1124_v62 }
  0xc0   :  { %v215_v47 = vsel %vm206_vm6, %v191_v31, %v214_v45  ;;  %v1209_v31 = vsub.s32 6, %v1117_v59 }
  0xc1   :  { %v113_v39 = vpop.xlane.xlu1 %112  ;;  %v207_v48 = vsel %vm206_vm6, %v159_v32, %v205_v46 }
  0xc2   :  { %v1170_v40 = vpop.xlane.xlu0 %88  ;;  %v195_v43 = vrot.slane %v113_v39, %v1124_v62 }
  0xc3   :  { %v163_v44 = vrot.slane %v1170_v40, %v1124_v62 }
  0xc4   :  { %v216_v55 = vsel %vm208_vm7, %v195_v43, %v215_v47 }
  0xc5   :  { %v209_v58 = vsel %vm208_vm7, %v163_v44, %v207_v48  ;;  %v223_v3 = vsel %vm219_vm8, %v216_v55, -inf }
  0xc6   :  { %v220_v4 = vsel %vm219_vm8, %v209_v58, -inf  ;;  %224 = vmax.xlane.f32.xlu1 %v223_v3 }
  0xc7   :  { %221 = vmax.xlane.f32.xlu0 %v220_v4 }
 0x153   :  { %v225_v14 = vpop.xlane.xlu1 %224 }
 0x154   :  { %v1189_v12 = vpop.xlane.xlu0 %221  ;;  %v279_v22 = vrot.slane %v225_v14, %v1192_v13  ;;  %v263_v25 = vrot.slane %v225_v14, %v1184_v8  ;;  %v283_v32 = vrot.slane %v225_v14, %v1199_v21  ;;  %v267_v34 = vrot.slane %v225_v14, %v1187_v11 }
 0x155   :  { %v231_v15 = vrot.slane %v1189_v12, %v1184_v8  ;;  %v235_v16 = vrot.slane %v1189_v12, %v1187_v11 }
 0x156   :  { %v320_v33 = vsub.f32 %v1119_v60, %v279_v22  ;;  %v316_v37 = vsub.f32 %v1101_v49, %v263_v25  ;;  %v321_v44 = vsub.f32 %v1126_v63, %v283_v32  ;;  %v317_v46 = vsub.f32 %v1105_v51, %v267_v34 }
 0x157   :  { %v308_v26 = vsub.f32 %v1103_v50, %v231_v15  ;;  %v309_v27 = vsub.f32 %v1107_v52, %v235_v16  ;;  %v1216_v50 = vsub.s32 7, %v1117_v59  ;;  %v287_v52 = vrot.slane %v225_v14, %v1209_v31 }
 0x158   :  { %v348_v45 = vmul.f32 1.442695, %v320_v33  ;;  %v340_v47 = vmul.f32 1.442695, %v316_v37  ;;  %v239_v60 = vrot.slane %v1189_v12, %v1206_v28  ;;  %v1224_v49 = vsub.s32 3, %v1117_v59 }
 0x159   :  { %v324_v38 = vmul.f32 1.442695, %v308_v26  ;;  %v326_v43 = vmul.f32 1.442695, %v309_v27  ;;  %v291_v48 = vrot.slane %v225_v14, %v1216_v50  ;;  %v322_v55 = vsub.f32 %v1150_v19, %v287_v52 }
 0x15a   :  { %v350_v58 = vmul.f32 1.442695, %v321_v44  ;;  %v271_v63 = vrot.slane %v225_v14, %v1206_v28  ;;  %v342_v3 = vmul.f32 1.442695, %v317_v46  ;;  %v310_v51 = vsub.f32 %v1111_v54, %v239_v60 }
 0x15b   :  { %887 = vpow2.f32 %v324_v38  ;;  %v323_v4 = vsub.f32 %v113_v39, %v291_v48  ;;  %v352_v7 = vmul.f32 1.442695, %v322_v55  ;;  %v243_v59 = vrot.slane %v1189_v12, %v1224_v49 }
 0x15c   :  { %889 = vpow2.f32 %v326_v43  ;;  %v318_v15 = vsub.f32 %v1109_v53, %v271_v63  ;;  %v328_v16 = vmul.f32 1.442695, %v310_v51  ;;  %v275_v54 = vrot.slane %v225_v14, %v1224_v49 }
 0x15d   :  { %891 = vpow2.f32 %v348_v45  ;;  %v354_v25 = vmul.f32 1.442695, %v323_v4  ;;  %v311_v53 = vsub.f32 %v1115_v57, %v243_v59  ;;  %v247_v33 = vrot.slane %v1189_v12, %v1192_v13 }
 0x15e   :  { %893 = vpow2.f32 %v340_v47  ;;  %v344_v39 = vmul.f32 1.442695, %v318_v15  ;;  %v319_v32 = vsub.f32 %v1113_v56, %v275_v54  ;;  %v251_v38 = vrot.slane %v1189_v12, %v1199_v21 }
 0x15f   :  { %895 = vpow2.f32 %v350_v58  ;;  %v330_v14 = vmul.f32 1.442695, %v311_v53  ;;  %v312_v43 = vsub.f32 %v1121_v61, %v247_v33  ;;  %v255_v44 = vrot.slane %v1189_v12, %v1209_v31 }
 0x160   :  { %897 = vpow2.f32 %v342_v3  ;;  %v346_v37 = vmul.f32 1.442695, %v319_v32  ;;  %v313_v45 = vsub.f32 %v1128_v1, %v251_v38  ;;  %v259_v61 = vrot.slane %v1189_v12, %v1216_v50 }
 0x161   :  { %899 = vpow2.f32 %v352_v7  ;;  %v332_v46 = vmul.f32 1.442695, %v312_v43  ;;  %v314_v48 = vsub.f32 %v1152_v20, %v255_v44 }
 0x162   :  { %901 = vpow2.f32 %v328_v16  ;;  %v334_v55 = vmul.f32 1.442695, %v313_v45  ;;  %v315_v1 = vsub.f32 %v1170_v40, %v259_v61 }
 0x163   :  { %903 = vpow2.f32 %v354_v25  ;;  %v336_v63 = vmul.f32 1.442695, %v314_v48 }
 0x164   :  { %905 = vpow2.f32 %v344_v39  ;;  %v338_v51 = vmul.f32 1.442695, %v315_v1 }
 0x165   :  { %v1233_v22 = vpop.eup %887  ;;  %907 = vpow2.f32 %v330_v14 }
 0x166   :  { %v1235_v19 = vpop.eup %889  ;;  %373 = vperm.xlu0 %885, %v1233_v22   ;;  %909 = vpow2.f32 %v346_v37 }
 0x167   :  { %376 = vperm.xlu1 %886, %v1235_v19   ;;  %v1241_v26 = vpop.eup %891  ;;  %911 = vpow2.f32 %v332_v46 }
 0x168   :  { %v1243_v27 = vpop.eup %893  ;;  %913 = vpow2.f32 %v334_v55 }
 0x169   :  { %v1250_v34 = vpop.eup %895  ;;  %915 = vpow2.f32 %v336_v63 }
 0x16a   :  { %409 = vperm.xlu0 %885, %v1241_v26   ;;  %v1252_v57 = vpop.eup %897  ;;  %917 = vpow2.f32 %v338_v51 }
 0x16b   :  { %397 = vperm.xlu1 %886, %v1243_v27   ;;  %v1259_v56 = vpop.eup %899 }
 0x16c   :  { %v1261_v52 = vpop.eup %901 }
 0x16d   :  { %v1268_v47 = vpop.eup %903 }
 0x16e   :  { %412 = vperm.xlu0 %885, %v1250_v34   ;;  %v1270_v60 = vpop.eup %905 }
 0x16f   :  { %400 = vperm.xlu1 %886, %v1252_v57   ;;  %v1277_v58 = vpop.eup %907 }
 0x170   :  { %v1281_v3 = vpop.eup %909 }
 0x171   :  { %v1284_v4 = vpop.eup %911 }
 0x172   :  { %415 = vperm.xlu0 %885, %v1259_v56   ;;  %v1287_v20 = vpop.eup %913 }
 0x173   :  { %379 = vperm.xlu1 %886, %v1261_v52   ;;  %v1290_v12 = vpop.eup %915 }
 0x174   :  { %v1293_v40 = vpop.eup %917 }
 0x176   :  { %418 = vperm.xlu0 %885, %v1268_v47  }
 0x177   :  { %403 = vperm.xlu1 %886, %v1270_v60  }
 0x17b   :  { %382 = vperm.xlu1 %886, %v1277_v58  }
 0x17f   :  { %406 = vperm.xlu1 %886, %v1281_v3  }
 0x183   :  { %385 = vperm.xlu1 %886, %v1284_v4  }
 0x187   :  { %388 = vperm.xlu1 %886, %v1287_v20  }
 0x18b   :  { %391 = vperm.xlu1 %886, %v1290_v12  }
 0x18f   :  { %394 = vperm.xlu1 %886, %v1293_v40  }
 0x1e5   :  { %v374_v15 = vpop.permute.xlu0 %373 }
 0x1e6   :  { %v377_v7 = vpop.permute.xlu1 %376 }
 0x1e9   :  { %v410_v16 = vpop.permute.xlu0 %409 }
 0x1ea   :  { %v398_v59 = vpop.permute.xlu1 %397  ;;  %v471_v46 = vrot.slane %v410_v16, %v1124_v62 }
 0x1eb   :  { %v455_v38 = vrot.slane %v398_v59, %v1124_v62 }
 0x1ed   :  { %v413_v39 = vpop.permute.xlu0 %412 }
 0x1ee   :  { %v401_v25 = vpop.permute.xlu1 %400  ;;  %v475_v55 = vrot.slane %v413_v39, %v1124_v62  ;;  %v427_v39 = vrot.slane %v377_v7, %v1124_v62 }
 0x1ef   :  { %v459_v14 = vrot.slane %v401_v25, %v1124_v62 }
 0x1f1   :  { %v416_v32 = vpop.permute.xlu0 %415  ;;  %v491_v44 = vsel %vm196_vm1, %v459_v14, %v455_v38 }
 0x1f2   :  { %v380_v54 = vpop.permute.xlu1 %379  ;;  %v479_v63 = vrot.slane %v416_v32, %v1124_v62 }
 0x1f3   :  { %v431_v32 = vrot.slane %v380_v54, %v1124_v62 }
 0x1f5   :  { %v419_v48 = vpop.permute.xlu0 %418 }
 0x1f6   :  { %v404_v53 = vpop.permute.xlu1 %403  ;;  %v483_v59 = vrot.slane %v419_v48, %v1124_v62 }
 0x1f7   :  { %v463_v37 = vrot.slane %v404_v53, %v1124_v62 }
 0x1f9   :  { %v492_v61 = vsel %vm198_vm2, %v463_v37, %v491_v44 }
 0x1fa   :  { %v383_v33 = vpop.permute.xlu1 %382 }
 0x1fb   :  { %v435_v44 = vrot.slane %v383_v33, %v1124_v62 }
 0x1fe   :  { %v407_v43 = vpop.permute.xlu1 %406 }
 0x1ff   :  { %v467_v45 = vrot.slane %v407_v43, %v1124_v62  ;;  %v423_v43 = vrot.slane %v374_v15, %v1124_v62 }
 0x201   :  { %v493_v1 = vsel %vm200_vm3, %v467_v45, %v492_v61  ;;  %v484_v61 = vsel %vm196_vm1, %v427_v39, %v423_v43 }
 0x202   :  { %v494_v51 = vsel %vm202_vm4, %v471_v46, %v493_v1  ;;  %v386_v25 = vpop.permute.xlu1 %385 }
 0x203   :  { %v495_v53 = vsel %vm204_vm5, %v475_v55, %v494_v51  ;;  %v439_v45 = vrot.slane %v386_v25, %v1124_v62  ;;  %v485_v55 = vsel %vm198_vm2, %v431_v32, %v484_v61 }
 0x204   :  { %v496_v14 = vsel %vm206_vm6, %v479_v63, %v495_v53  ;;  %v486_v7 = vsel %vm200_vm3, %v435_v44, %v485_v55 }
 0x205   :  { %v497_v16 = vsel %vm208_vm7, %v483_v59, %v496_v14  ;;  %v487_v15 = vsel %vm202_vm4, %v439_v45, %v486_v7 }
 0x206   :  { %v389_v38 = vpop.permute.xlu1 %388  ;;  %v503_v37 = vsel %vm219_vm8, %v497_v16, 0.0 }
 0x207   :  { %504 = vadd.xlane.f32.xlu0 %v503_v37  ;;  %v443_v48 = vrot.slane %v389_v38, %v1124_v62 }
 0x209   :  { %v488_v54 = vsel %vm204_vm5, %v443_v48, %v487_v15 }
 0x20a   :  { %v392_v46 = vpop.permute.xlu1 %391 }
 0x20b   :  { %v447_v1 = vrot.slane %v392_v46, %v1124_v62 }
 0x20d   :  { %v489_v51 = vsel %vm206_vm6, %v447_v1, %v488_v54 }
 0x20e   :  { %v395_v63 = vpop.permute.xlu1 %394 }
 0x20f   :  { %v451_v33 = vrot.slane %v395_v63, %v1124_v62 }
 0x211   :  { %v490_v25 = vsel %vm208_vm7, %v451_v33, %v489_v51 }
 0x212   :  { %v500_v59 = vsel %vm219_vm8, %v490_v25, 0.0 }
 0x213   :  { %501 = vadd.xlane.f32.xlu1 %v500_v59 }
 0x294   :  { %v505_v53 = vpop.xlane.xlu0 %504 }
 0x295   :  { %v543_v37 = vrot.slane %v505_v53, %v1184_v8  ;;  %v547_v39 = vrot.slane %v505_v53, %v1187_v11  ;;  %v551_v43 = vrot.slane %v505_v53, %v1206_v28  ;;  %v555_v44 = vrot.slane %v505_v53, %v1224_v49 }
 0x296   :  { %v559_v61 = vrot.slane %v505_v53, %v1192_v13  ;;  %v563_v7 = vrot.slane %v505_v53, %v1199_v21  ;;  %v567_v54 = vrot.slane %v505_v53, %v1209_v31  ;;  %v571_v25 = vrot.slane %v505_v53, %v1216_v50 }
 0x2a0   :  { %v502_v14 = vpop.xlane.xlu1 %501 }
 0x2a1   :  { %v515_v16 = vrot.slane %v502_v14, %v1187_v11  ;;  %v511_v38 = vrot.slane %v502_v14, %v1184_v8  ;;  %v519_v62 = vrot.slane %v502_v14, %v1206_v28  ;;  %v523_v32 = vrot.slane %v502_v14, %v1224_v49 }
 0x2a2   :  { %v527_v8 = vrot.slane %v502_v14, %v1192_v13  ;;  %v531_v1 = vrot.slane %v502_v14, %v1199_v21  ;;  %v535_v13 = vrot.slane %v502_v14, %v1209_v31  ;;  %v539_v21 = vrot.slane %v502_v14, %v1216_v50 }
 0x2a3   :  { %919 = vrcp.f32 %v515_v16 }
 0x2a4   :  { %921 = vrcp.f32 %v511_v38 }
 0x2a5   :  { %923 = vrcp.f32 %v543_v37 }
 0x2a6   :  { %925 = vrcp.f32 %v547_v39 }
 0x2a7   :  { %927 = vrcp.f32 %v519_v62 }
 0x2a8   :  { %929 = vrcp.f32 %v551_v43 }
 0x2a9   :  { %931 = vrcp.f32 %v523_v32 }
 0x2aa   :  { %933 = vrcp.f32 %v555_v44 }
 0x2ab   :  { %935 = vrcp.f32 %v527_v8 }
 0x2ac   :  { %937 = vrcp.f32 %v559_v61 }
 0x2ad   :  { %v920_v45 = vpop.eup %919  ;;  %939 = vrcp.f32 %v531_v1 }
 0x2ae   :  { %v922_v46 = vpop.eup %921  ;;  %v591_v11 = vmul.f32 %v920_v45, %v1235_v19  ;;  %941 = vrcp.f32 %v563_v7 }
 0x2af   :  { %v924_v48 = vpop.eup %923  ;;  %v589_v55 = vmul.f32 %v922_v46, %v1233_v22  ;;  %943 = vrcp.f32 %v535_v13 }
 0x2b0   :  { %v926_v28 = vpop.eup %925  ;;  %627 = vperm.xlu1 %886, %v591_v11   ;;  %v605_v49 = vmul.f32 %v924_v48, %v1243_v27  ;;  %945 = vrcp.f32 %v567_v54 }
 0x2b1   :  { %622 = vperm.xlu0 %885, %v589_v55   ;;  %v928_v15 = vpop.eup %927  ;;  %v607_v19 = vmul.f32 %v926_v28, %v1252_v57  ;;  %947 = vrcp.f32 %v539_v21 }
 0x2b2   :  { %v930_v63 = vpop.eup %929  ;;  %v593_v22 = vmul.f32 %v928_v15, %v1261_v52  ;;  %949 = vrcp.f32 %v571_v25 }
 0x2b3   :  { %v932_v33 = vpop.eup %931  ;;  %v609_v27 = vmul.f32 %v930_v63, %v1270_v60 }
 0x2b4   :  { %662 = vperm.xlu1 %886, %v605_v49   ;;  %v934_v51 = vpop.eup %933  ;;  %v595_v57 = vmul.f32 %v932_v33, %v1277_v58 }
 0x2b5   :  { %667 = vperm.xlu0 %885, %v607_v19   ;;  %v936_v59 = vpop.eup %935  ;;  %v611_v52 = vmul.f32 %v934_v51, %v1281_v3 }
 0x2b6   :  { %v938_v16 = vpop.eup %937  ;;  %v597_v31 = vmul.f32 %v936_v59, %v1284_v4 }
 0x2b7   :  { %v940_v60 = vpop.eup %939  ;;  %v613_v38 = vmul.f32 %v938_v16, %v1241_v26 }
 0x2b8   :  { %632 = vperm.xlu1 %886, %v593_v22   ;;  %v942_v37 = vpop.eup %941  ;;  %v599_v58 = vmul.f32 %v940_v60, %v1287_v20 }
 0x2b9   :  { %672 = vperm.xlu0 %885, %v609_v27   ;;  %v944_v14 = vpop.eup %943  ;;  %v615_v50 = vmul.f32 %v942_v37, %v1250_v34 }
 0x2ba   :  { %v946_v53 = vpop.eup %945  ;;  %v601_v3 = vmul.f32 %v944_v14, %v1290_v12 }
 0x2bb   :  { %v948_v39 = vpop.eup %947  ;;  %v617_v4 = vmul.f32 %v946_v53, %v1259_v56 }
 0x2bc   :  { %637 = vperm.xlu1 %886, %v595_v57   ;;  %v950_v62 = vpop.eup %949  ;;  %v603_v26 = vmul.f32 %v948_v39, %v1293_v40 }
 0x2bd   :  { %677 = vperm.xlu0 %885, %v611_v52   ;;  %v619_v43 = vmul.f32 %v950_v62, %v1268_v47 }
 0x2c0   :  { %642 = vperm.xlu1 %886, %v597_v31  }
 0x2c1   :  { %682 = vperm.xlu0 %885, %v613_v38  }
 0x2c4   :  { %647 = vperm.xlu1 %886, %v599_v58  }
 0x2c5   :  { %687 = vperm.xlu0 %885, %v615_v50  }
 0x2c8   :  { %652 = vperm.xlu1 %886, %v601_v3  }
 0x2c9   :  { %692 = vperm.xlu0 %885, %v617_v4  }
 0x2cc   :  { %657 = vperm.xlu1 %886, %v603_v26  }
 0x2cd   :  { %697 = vperm.xlu0 %885, %v619_v43  }
 0x32f   :  { %v628_v20 = vpop.permute.xlu1 %627 }
 0x330   :  { %v701_v34 = vmul.f32 %v628_v20, %v1045_v6  ;;  %v623_v32 = vpop.permute.xlu0 %622 }
 0x331   :  { %v700_v44 = vmul.f32 %v623_v32, %v1039_v2 }
 0x332   :  { %v723_v12 = vsel %vm65_vm0, %v701_v34, 0.0 }
 0x333   :  { %v724_v45 = vrot.slane %v723_v12, 4  ;;  %v716_v56 = vsel %vm65_vm0, %v700_v44, 0.0  ;;  %v663_v8 = vpop.permute.xlu1 %662 }
 0x334   :  { %v717_v46 = vrot.slane %v716_v56, 4  ;;  %v708_v11 = vmul.f32 %v663_v8, %v1034_v0  ;;  %v668_v40 = vpop.permute.xlu0 %667 }
 0x335   :  { %v725_v61 = vadd.f32 %v724_v45, %v723_v12  ;;  %v709_v47 = vmul.f32 %v668_v40, %v1043_v5 }
 0x336   :  { %v718_v48 = vadd.f32 %v717_v46, %v716_v56  ;;  %v772_v55 = vsel %vm65_vm0, %v708_v11, 0.0 }
 0x337   :  { %v726_v6 = vrot.slane %v725_v61, 2  ;;  %v773_v28 = vrot.slane %v772_v55, 4  ;;  %v779_v2 = vsel %vm65_vm0, %v709_v47, 0.0  ;;  %v633_v1 = vpop.permute.xlu1 %632 }
 0x338   :  { %v719_v49 = vrot.slane %v718_v48, 2  ;;  %v780_v7 = vrot.slane %v779_v2, 4  ;;  %v702_v15 = vmul.f32 %v633_v1, %v1051_v10  ;;  %v673_v19 = vpop.permute.xlu0 %672 }
 0x339   :  { %v774_v63 = vadd.f32 %v773_v28, %v772_v55  ;;  %v710_v0 = vmul.f32 %v673_v19, %v1049_v9  ;;  %v727_v13 = vadd.f32 %v726_v6, %v725_v61 }
 0x33a   :  { %v720_v22 = vadd.f32 %v719_v49, %v718_v48  ;;  %v781_v54 = vadd.f32 %v780_v7, %v779_v2  ;;  %v730_v5 = vsel %vm65_vm0, %v702_v15, 0.0 }
 0x33b   :  { %v638_v33 = vpop.permute.xlu1 %637  ;;  %v775_v21 = vrot.slane %v774_v63, 2  ;;  %v786_v57 = vsel %vm65_vm0, %v710_v0, 0.0  ;;  %v731_v59 = vrot.slane %v730_v5, 4  ;;  %v728_v52 = vrot.slane %v727_v13, 1 }
 0x33c   :  { %v703_v27 = vmul.f32 %v638_v33, %v1061_v18  ;;  %v678_v51 = vpop.permute.xlu0 %677  ;;  %v721_v16 = vrot.slane %v720_v22, 1  ;;  %v782_v9 = vrot.slane %v781_v54, 2  ;;  %v787_v38 = vrot.slane %v786_v57, 4 }
 0x33d   :  { %v711_v25 = vmul.f32 %v678_v51, %v1059_v17  ;;  %v776_v18 = vadd.f32 %v775_v21, %v774_v63  ;;  %v732_v53 = vadd.f32 %v731_v59, %v730_v5  ;;  %v729_v17 = vadd.f32 %v728_v52, %v727_v13 }
 0x33e   :  { %v737_v10 = vsel %vm65_vm0, %v703_v27, 0.0  ;;  %v722_v39 = vadd.f32 %v721_v16, %v720_v22  ;;  %v783_v4 = vadd.f32 %v782_v9, %v781_v54  ;;  %v788_v43 = vadd.f32 %v787_v38, %v786_v57 }
 0x33f   :  { %v793_v31 = vsel %vm65_vm0, %v711_v25, 0.0  ;;  %v643_v60 = vpop.permute.xlu1 %642  ;;  %v738_v37 = vrot.slane %v737_v10, 4  ;;  %v777_v12 = vrot.slane %v776_v18, 1 }
 0x340   :  { %v794_v58 = vrot.slane %v793_v31, 4  ;;  %v683_v14 = vpop.permute.xlu0 %682  ;;  %v704_v50 = vmul.f32 %v643_v60, %v1069_v24  ;;  %v733_v24 = vrot.slane %v732_v53, 2  ;;  %v784_v11 = vrot.slane %v783_v4, 1 }
 0x341   :  { %v712_v3 = vmul.f32 %v683_v14, %v1067_v23  ;;  %v739_v20 = vadd.f32 %v738_v37, %v737_v10  ;;  %v1382_v23 = vsel %vm196_vm1, %v729_v17, %v722_v39  ;;  %v789_v48 = vrot.slane %v788_v43, 2 }
 0x342   :  { %v744_v62 = vsel %vm65_vm0, %v704_v50, 0.0  ;;  %v795_v34 = vadd.f32 %v794_v58, %v793_v31  ;;  %v778_v1 = vadd.f32 %v777_v12, %v776_v18  ;;  %v734_v15 = vadd.f32 %v733_v24, %v732_v53 }
 0x343   :  { %v648_v26 = vpop.permute.xlu1 %647  ;;  %v745_v32 = vrot.slane %v744_v62, 4  ;;  %v800_v45 = vsel %vm65_vm0, %v712_v3, 0.0  ;;  %v740_v55 = vrot.slane %v739_v20, 2  ;;  %v785_v13 = vadd.f32 %v784_v11, %v783_v4 }
 0x344   :  { %v688_v44 = vpop.permute.xlu0 %687  ;;  %v705_v56 = vmul.f32 %v648_v26, %v1077_v30  ;;  %v801_v46 = vrot.slane %v800_v45, 4  ;;  %v796_v6 = vrot.slane %v795_v34, 2  ;;  %v790_v33 = vadd.f32 %v789_v48, %v788_v43 }
 0x345   :  { %v746_v8 = vadd.f32 %v745_v32, %v744_v62  ;;  %v713_v61 = vmul.f32 %v688_v44, %v1075_v29  ;;  %v741_v27 = vadd.f32 %v740_v55, %v739_v20  ;;  %v735_v58 = vrot.slane %v734_v15, 1 }
 0x346   :  { %v751_v40 = vsel %vm65_vm0, %v705_v56, 0.0  ;;  %v802_v28 = vadd.f32 %v801_v46, %v800_v45  ;;  %v797_v51 = vadd.f32 %v796_v6, %v795_v34  ;;  %v791_v14 = vrot.slane %v790_v33, 1 }
 0x347   :  { %v653_v47 = vpop.permute.xlu1 %652  ;;  %v752_v49 = vrot.slane %v751_v40, 4  ;;  %v807_v30 = vsel %vm65_vm0, %v713_v61, 0.0  ;;  %v747_v19 = vrot.slane %v746_v8, 2  ;;  %v742_v53 = vrot.slane %v741_v27, 1 }
 0x348   :  { %v693_v2 = vpop.permute.xlu0 %692  ;;  %v706_v7 = vmul.f32 %v653_v47, %v1085_v36  ;;  %v803_v63 = vrot.slane %v802_v28, 2  ;;  %v808_v0 = vrot.slane %v807_v30, 4  ;;  %v736_v44 = vadd.f32 %v735_v58, %v734_v15 }
 0x349   :  { %v753_v22 = vadd.f32 %v752_v49, %v751_v40  ;;  %v714_v54 = vmul.f32 %v693_v2, %v1083_v35  ;;  %v748_v52 = vadd.f32 %v747_v19, %v746_v8  ;;  %v792_v56 = vadd.f32 %v791_v14, %v790_v33 }
 0x34a   :  { %v758_v29 = vsel %vm65_vm0, %v706_v7, 0.0  ;;  %v809_v21 = vadd.f32 %v808_v0, %v807_v30  ;;  %v804_v16 = vadd.f32 %v803_v63, %v802_v28  ;;  %v743_v24 = vadd.f32 %v742_v53, %v741_v27 }
 0x34b   :  { %v658_v5 = vpop.permute.xlu1 %657  ;;  %v754_v25 = vrot.slane %v753_v22, 2  ;;  %v759_v59 = vrot.slane %v758_v29, 4  ;;  %v814_v36 = vsel %vm65_vm0, %v714_v54, 0.0  ;;  %v749_v4 = vrot.slane %v748_v52, 1 }
 0x34c   :  { %v698_v57 = vpop.permute.xlu0 %697  ;;  %v707_v10 = vmul.f32 %v658_v5, %v1093_v42  ;;  %v810_v9 = vrot.slane %v809_v21, 2  ;;  %v815_v31 = vrot.slane %v814_v36, 4  ;;  %v798_v42 = vrot.slane %v797_v51, 1 }
 0x34d   :  { %v755_v60 = vadd.f32 %v754_v25, %v753_v22  ;;  %v760_v38 = vadd.f32 %v759_v59, %v758_v29  ;;  %v715_v37 = vmul.f32 %v698_v57, %v1091_v41  ;;  %v805_v43 = vrot.slane %v804_v16, 1 }
 0x34e   :  { %v765_v35 = vsel %vm65_vm0, %v707_v10, 0.0  ;;  %v811_v18 = vadd.f32 %v810_v9, %v809_v21  ;;  %v816_v50 = vadd.f32 %v815_v31, %v814_v36  ;;  %v799_v11 = vadd.f32 %v798_v42, %v797_v51 }
 0x34f   :  { %v761_v3 = vrot.slane %v760_v38, 2  ;;  %v766_v17 = vrot.slane %v765_v35, 4  ;;  %v821_v39 = vsel %vm65_vm0, %v715_v37, 0.0  ;;  %v756_v20 = vrot.slane %v755_v60, 1 }
 0x350   :  { %v817_v62 = vrot.slane %v816_v50, 2  ;;  %v822_v26 = vrot.slane %v821_v39, 4  ;;  %v812_v12 = vrot.slane %v811_v18, 1  ;;  %v750_v40 = vadd.f32 %v749_v4, %v748_v52 }
 0x351   :  { %v762_v34 = vadd.f32 %v761_v3, %v760_v38  ;;  %v767_v32 = vadd.f32 %v766_v17, %v765_v35  ;;  %v851_v48 = vsel %vm196_vm1, %v785_v13, %v778_v1  ;;  %v806_v55 = vadd.f32 %v805_v43, %v804_v16 }
 0x352   :  { %v818_v41 = vadd.f32 %v817_v62, %v816_v50  ;;  %v823_v45 = vadd.f32 %v822_v26, %v821_v39  ;;  %v757_v6 = vadd.f32 %v756_v20, %v755_v60  ;;  %v845_v2 = vsel %vm198_vm2, %v736_v44, %v1382_v23 }
 0x353   :  { %v763_v8 = vrot.slane %v762_v34, 1  ;;  %v768_v46 = vrot.slane %v767_v32, 2  ;;  %v813_v49 = vadd.f32 %v812_v12, %v811_v18  ;;  %v852_v15 = vsel %vm198_vm2, %v792_v56, %v851_v48 }
 0x354   :  { %v819_v61 = vrot.slane %v818_v41, 1  ;;  %v824_v47 = vrot.slane %v823_v45, 2  ;;  %v846_v19 = vsel %vm200_vm3, %v743_v24, %v845_v2  ;;  %v853_v22 = vsel %vm200_vm3, %v799_v11, %v852_v15 }
 0x355   :  { %v769_v28 = vadd.f32 %v768_v46, %v767_v32  ;;  %v764_v30 = vadd.f32 %v763_v8, %v762_v34  ;;  %v847_v29 = vsel %vm202_vm4, %v750_v40, %v846_v19  ;;  %v854_v13 = vsel %vm202_vm4, %v806_v55, %v853_v22 }
 0x356   :  { %v825_v7 = vadd.f32 %v824_v47, %v823_v45  ;;  %v820_v63 = vadd.f32 %v819_v61, %v818_v41  ;;  %v848_v23 = vsel %vm204_vm5, %v757_v6, %v847_v29  ;;  %v855_v27 = vsel %vm204_vm5, %v813_v49, %v854_v13 }
 0x357   :  { %v770_v0 = vrot.slane %v769_v28, 1  ;;  %v849_v33 = vsel %vm206_vm6, %v764_v30, %v848_v23 }
 0x358   :  { %v826_v1 = vrot.slane %v825_v7, 1  ;;  %v856_v21 = vsel %vm206_vm6, %v820_v63, %v855_v27 }
 0x359   :  { %v771_v54 = vadd.f32 %v770_v0, %v769_v28 }
 0x35a   :  { %v827_v5 = vadd.f32 %v826_v1, %v825_v7 }
 0x35b   :  { %v850_v51 = vsel %vm208_vm7, %v771_v54, %v849_v33 }
 0x35c   :  { %v857_v57 = vsel %vm208_vm7, %v827_v5, %v856_v21  ;;  %860 = vst.msk [vmem:[#allocation5] sm:$0xff] %vm65_vm0, %v850_v51 }
 0x35d   :  { %861 = vst.msk [vmem:[#allocation5 + $0x8] sm:$0xff] %vm65_vm0, %v857_v57 }
 0x35e   :  { %984 = shalt.err (!%p981_p12)
}
 0x35f   :  { %s985_s28 = scalar_lea.hbm %s1428_s2, 256 }
 0x360   :  { %p986_p13 = scmp.ne.s32.totalorder %s1428_s2, %s985_s28  ;;  %p989_p0 = scmp.lt.u32.totalorder %s985_s28, %s1428_s2 }
 0x362   :  { %p991_p1 = pnand %p989_p0, %p986_p13 }
 0x364   :  { %994 = shalt.err (!%p991_p1)
}
 0x365   :  { %873 = dma.vmem_to_hbm [thread:$0]  %s868_s1, 256, %s1428_s2, [#allocation4], %s1000_s19, %s1000_s19, %s1001_s20  }
 0x366   :  { %997 = dma.done.wait [#allocation4], 256  }
 0x367   :  { %998 = vsyncadd [#allocation4], 4294967040 }
 0x368   :  { %877 = vsyncpa [#allocation3], 1 }
 0x369   :  { %878 = vsyncpa [#allocation4], 1 }

</bundles_post_ra>
